<compile_context>
chip_gen: v6e
topology: v6e:2x2x1
jax: 0.10.0
libtpu: 0.0.40
codegen_flags: <defaults>
</compile_context>

<pallas_src>
import functools
import math

import jax
import jax.numpy as jnp
from jax.experimental import pallas as pl
from jax.experimental.pallas import tpu as pltpu

MARGIN = 1.0
EPS = 1e-6  # matches torch.nn.functional.pairwise_distance default eps


def _round_up(x, m):
    return (x + m - 1) // m * m


def _loss_kernel(o1_ref, o2_ref, lab_ref, out_ref, *, margin, batch_true, tile_b):
    i = pl.program_id(0)

    # Native (tile_b, D) block: batch on sublanes, features on lanes.
    diff = o1_ref[...] - o2_ref[...] + EPS                      # (TB, D)
    d2 = jnp.sum(diff * diff, axis=-1, keepdims=True)           # (TB, 1), XLU lane-reduce
    # (sqrt -> square round trip of the torch code is a no-op; use d2 directly)

    dfm = jnp.minimum(d2 - margin, 50.0)                        # clamp(max=50)
    exp_dfm = jnp.exp(dfm)
    softplus = jnp.log1p(exp_dfm)                               # log(1 + exp(dfm))

    log_c = math.log1p(math.exp(-margin))                       # log(1 + e^-m), const
    exp_neg_m = math.exp(-margin)

    # dbl = (1 + e^-m) / (1 + exp(dfm))
    #   log(dbl)     = log(1 + e^-m)        - softplus(dfm)
    #   log(1 - dbl) = log(exp(dfm) - e^-m) - softplus(dfm)
    # (log(exp_dfm - e^-m) -> -inf when d2 ~ 0 with label=1, matching the
    #  reference PyTorch formulation's behavior.)
    lab = lab_ref[...]                                          # (TB, 1)
    log_dbl = log_c - softplus
    log_one_minus_dbl = jnp.log(exp_dfm - exp_neg_m) - softplus

    per_sample = -0.5 * ((1.0 - lab) * log_dbl + lab * log_one_minus_dbl)

    # Mask batch rows past the true batch (only the overhanging last block has
    # any); jnp.where is a select, so garbage/NaN rows never enter the sum.
    row = i * tile_b + jax.lax.broadcasted_iota(jnp.int32, per_sample.shape, 0)
    per_sample = jnp.where(row < batch_true, per_sample, 0.0)

    psum = jnp.sum(per_sample)                                  # per-tile partial
    out_ref[...] = jnp.broadcast_to(psum, out_ref.shape).astype(jnp.float32)


def _vmem_capacity_bytes():
    try:
        return int(pltpu.get_tpu_info().vmem_capacity_bytes)
    except Exception:
        return 64 << 20  # conservative fallback (v7x per-TC VMEM)


def distance_based_loss(output1, output2, label, margin=MARGIN):
    """Pallas TPU implementation of DistanceBasedLoss.forward."""
    output1 = jnp.asarray(output1, jnp.float32)
    output2 = jnp.asarray(output2, jnp.float32)
    b, d = output1.shape
    label2d = jnp.asarray(label, jnp.float32).reshape(b, 1)     # no data movement

    # Generation-aware budgets: ~8 MiB input blocks / 48 MiB VMEM limit on v7x
    # (64 MiB physical); ~16 MiB blocks / 96 MiB limit on v5e/v6e (128 MiB).
    vmem = _vmem_capacity_bytes()
    if vmem >= (100 << 20):
        block_budget, vmem_limit = 16 << 20, 96 << 20
    else:
        block_budget, vmem_limit = 8 << 20, 48 << 20

    bytes_per_row = 4 * d
    rows_budget = max(8, (block_budget // bytes_per_row) // 8 * 8)
    tile_b = min(rows_budget, _round_up(b, 8))
    # Prefer >= 2 tiles (so both v7x TensorCores get work) as long as each
    # block stays >= ~1 MiB (keeps the pipeline bandwidth-bound, not
    # overhead-bound).  Neutral on single-TC v5e/v6e.
    min_rows = max(8, ((1 << 20) // bytes_per_row) // 8 * 8)
    half_rows = _round_up((b + 1) // 2, 8)
    if tile_b >= b and half_rows >= min_rows:
        tile_b = half_rows

    num_tiles = pl.cdiv(b, tile_b)
    grid = (num_tiles,)

    kernel = functools.partial(
        _loss_kernel, margin=float(margin), batch_true=b, tile_b=tile_b)

    cost = pl.CostEstimate(
        flops=3 * b * d + 14 * b,
        transcendentals=3 * b,
        bytes_accessed=2 * b * d * 4 + b * 4 + num_tiles * 8 * 128 * 4)

    partials = pl.pallas_call(
        kernel,
        out_shape=jax.ShapeDtypeStruct((num_tiles, 8, 128), jnp.float32),
        grid_spec=pltpu.PrefetchScalarGridSpec(
            num_scalar_prefetch=0,
            grid=grid,
            in_specs=[
                pl.BlockSpec((tile_b, d), lambda i: (i, 0)),
                pl.BlockSpec((tile_b, d), lambda i: (i, 0)),
                pl.BlockSpec((tile_b, 1), lambda i: (i, 0)),
            ],
            out_specs=pl.BlockSpec((1, 8, 128), lambda i: (i, 0, 0)),
        ),
        compiler_params=pltpu.CompilerParams(
            dimension_semantics=("parallel",),
            vmem_limit_bytes=vmem_limit),
        cost_estimate=cost,
    )(output1, output2, label2d)

    # Tiny per-tile partials: reduce in the wrapper (pairwise, megacore-safe).
    return jnp.sum(partials[:, 0, 0]) / b


def _reference(output1, output2, label, margin=MARGIN):
    """Pure-JAX reference mirroring the PyTorch forward."""
    diff = output1 - output2 + EPS
    euclid = jnp.sqrt(jnp.sum(diff * diff, axis=1))
    dfm = jnp.minimum(euclid ** 2 - margin, 50.0)
    dbl = (1.0 + math.exp(-margin)) / (1.0 + jnp.exp(dfm))
    sim = -0.5 * (1.0 - label) * jnp.log(dbl)
    dis = -0.5 * label * jnp.log(1.0 - dbl)
    return jnp.mean(sim + dis)


if __name__ == "__main__":
    key = jax.random.PRNGKey(0)
    k1, k2, k3 = jax.random.split(key, 3)

    B, D = 8, 32
    output1 = jax.random.normal(k1, (B, D), dtype=jnp.float32)
    output2 = jax.random.normal(k2, (B, D), dtype=jnp.float32)
    label = jax.random.bernoulli(k3, 0.5, (B,)).astype(jnp.float32)

    loss = distance_based_loss(output1, output2, label)
    jax.block_until_ready(loss)

    ref = _reference(output1, output2, label)
    assert jnp.allclose(loss, ref, rtol=1e-5, atol=1e-5), (loss, ref)

    print("KERNEL_OK")
</pallas_src>

<mosaic_0001>
module attributes {stable_mosaic.version = 11 : i64} {
  func.func @_loss_kernel(%arg0: i32, %arg1: memref<8x32xf32, #tpu.memory_space<vmem>>, %arg2: memref<8x32xf32, #tpu.memory_space<vmem>>, %arg3: memref<8x1xf32, #tpu.memory_space<vmem>>, %arg4: memref<1x8x128xf32, #tpu.memory_space<vmem>>) attributes {dimension_semantics = [#tpu.dimension_semantics<parallel>], iteration_bounds = array<i64: 1>, scalar_prefetch = 0 : i64, scratch_operands = 0 : i64, tpu.core_type = #tpu.core_type<tc>, window_params = [{transform_indices = @transform_0, window_bounds = array<i64: 8, 32>}, {transform_indices = @transform_1, window_bounds = array<i64: 8, 32>}, {transform_indices = @transform_2, window_bounds = array<i64: 8, 1>}, {transform_indices = @transform_3, window_bounds = array<i64: 1, 8, 128>}]} {
    %c0 = arith.constant 0 : index
    %c0_0 = arith.constant 0 : index
    %0 = vector.load %arg1[%c0, %c0_0] : memref<8x32xf32, #tpu.memory_space<vmem>>, vector<8x32xf32>
    %c0_1 = arith.constant 0 : index
    %c0_2 = arith.constant 0 : index
    %1 = vector.load %arg2[%c0_1, %c0_2] : memref<8x32xf32, #tpu.memory_space<vmem>>, vector<8x32xf32>
    %2 = arith.subf %0, %1 : vector<8x32xf32>
    %cst = arith.constant 9.99999997E-7 : f32
    %3 = vector.broadcast %cst : f32 to vector<8x32xf32>
    %4 = arith.addf %2, %3 : vector<8x32xf32>
    %5 = arith.mulf %4, %4 : vector<8x32xf32>
    %cst_3 = arith.constant dense<0.000000e+00> : vector<8xf32>
    %6 = vector.multi_reduction <add>, %5, %cst_3 [1] : vector<8x32xf32> to vector<8xf32>
    %7 = vector.shape_cast %6 : vector<8xf32> to vector<8x1xf32>
    %cst_4 = arith.constant 1.000000e+00 : f32
    %8 = vector.broadcast %cst_4 : f32 to vector<8x1xf32>
    %9 = arith.subf %7, %8 : vector<8x1xf32>
    %cst_5 = arith.constant 5.000000e+01 : f32
    %10 = vector.broadcast %cst_5 : f32 to vector<8x1xf32>
    %11 = arith.minimumf %9, %10 : vector<8x1xf32>
    %12 = math.exp %11 : vector<8x1xf32>
    %13 = math.log1p %12 : vector<8x1xf32>
    %c0_6 = arith.constant 0 : index
    %c0_7 = arith.constant 0 : index
    %14 = vector.load %arg3[%c0_6, %c0_7] : memref<8x1xf32, #tpu.memory_space<vmem>>, vector<8x1xf32>
    %cst_8 = arith.constant 0.313261688 : f32
    %15 = vector.broadcast %cst_8 : f32 to vector<8x1xf32>
    %16 = arith.subf %15, %13 : vector<8x1xf32>
    %cst_9 = arith.constant 0.36787945 : f32
    %17 = vector.broadcast %cst_9 : f32 to vector<8x1xf32>
    %18 = arith.subf %12, %17 : vector<8x1xf32>
    %19 = math.log %18 : vector<8x1xf32>
    %20 = arith.subf %19, %13 : vector<8x1xf32>
    %cst_10 = arith.constant 1.000000e+00 : f32
    %21 = vector.broadcast %cst_10 : f32 to vector<8x1xf32>
    %22 = arith.subf %21, %14 : vector<8x1xf32>
    %23 = arith.mulf %22, %16 : vector<8x1xf32>
    %24 = arith.mulf %14, %20 : vector<8x1xf32>
    %25 = arith.addf %23, %24 : vector<8x1xf32>
    %cst_11 = arith.constant -5.000000e-01 : f32
    %26 = vector.broadcast %cst_11 : f32 to vector<8x1xf32>
    %27 = arith.mulf %26, %25 : vector<8x1xf32>
    %c8_i32 = arith.constant 8 : i32
    %28 = arith.muli %arg0, %c8_i32 : i32
    %29 = tpu.iota {dimensions = array<i32: 0>} : vector<8x1xi32>
    %30 = vector.broadcast %28 : i32 to vector<8x1xi32>
    %31 = arith.addi %30, %29 : vector<8x1xi32>
    %c8_i32_12 = arith.constant 8 : i32
    %32 = vector.broadcast %c8_i32_12 : i32 to vector<8x1xi32>
    %33 = arith.cmpi slt, %31, %32 : vector<8x1xi32>
    %cst_13 = arith.constant 0.000000e+00 : f32
    %34 = vector.broadcast %cst_13 : f32 to vector<8x1xf32>
    %35 = arith.select %33, %27, %34 : vector<8x1xi1>, vector<8x1xf32>
    %36 = vector.shape_cast %35 : vector<8x1xf32> to vector<1x8x1xf32>
    %cst_14 = arith.constant dense<0.000000e+00> : vector<1xf32>
    %37 = vector.multi_reduction <add>, %36, %cst_14 [1, 2] : vector<1x8x1xf32> to vector<1xf32>
    %38 = vector.shape_cast %37 : vector<1xf32> to vector<1x1x1xf32>
    %39 = vector.extract %38[0, 0, 0] : f32 from vector<1x1x1xf32>
    %40 = vector.broadcast %39 : f32 to vector<1x8x128xf32>
    %c0_15 = arith.constant 0 : index
    %c0_16 = arith.constant 0 : index
    %c0_17 = arith.constant 0 : index
    %41 = vector.load %arg4[%c0_15, %c0_16, %c0_17] : memref<1x8x128xf32, #tpu.memory_space<vmem>>, vector<1x8x128xf32>
    tpu.vector_store %arg4[%c0_15, %c0_16, %c0_17], %40 {strides = array<i32>} : memref<1x8x128xf32, #tpu.memory_space<vmem>>, vector<1x8x128xf32>,
    return
  }
  func.func @transform_0(%arg0: i32) -> (i32, i32) {
    %c0_i32 = arith.constant 0 : i32
    %c0_i32_0 = arith.constant 0 : i32
    return %arg0, %c0_i32 : i32, i32
  }
  func.func @transform_1(%arg0: i32) -> (i32, i32) {
    %c0_i32 = arith.constant 0 : i32
    %c0_i32_0 = arith.constant 0 : i32
    return %arg0, %c0_i32 : i32, i32
  }
  func.func @transform_2(%arg0: i32) -> (i32, i32) {
    %c0_i32 = arith.constant 0 : i32
    %c0_i32_0 = arith.constant 0 : i32
    return %arg0, %c0_i32 : i32, i32
  }
  func.func @transform_3(%arg0: i32) -> (i32, i32, i32) {
    %c0_i32 = arith.constant 0 : i32
    %c0_i32_0 = arith.constant 0 : i32
    %c0_i32_1 = arith.constant 0 : i32
    return %arg0, %c0_i32, %c0_i32_0 : i32, i32, i32
  }
}

</mosaic_0001>

<bundles_post_ra>
// kernel: tpu_custom_call.1
= control target key start
LH: loop header
LB: loop body
LE: loop exit
PB: predicated region body
PF: predicated region fallthrough
CT: control target
= control target key end

     0   :  { %8 = vsyncpa [#allocation3], 0  ;;  %s185_s0 = inlined_call_operand.vmem [shape: f32[8,32], index: 0, kind: input, shape index: {}]   ;;  %s186_s1 = inlined_call_operand.hbm [shape: f32[8,32], index: 1, kind: input, shape index: {}]   ;;  %s187_s2 = inlined_call_operand.vmem [shape: f32[8,1], index: 2, kind: input, shape index: {}]   ;;  %s188_s3 = inlined_call_operand.hbm [shape: f32[1,8,128], index: 3, kind: output, shape index: {}]  }
   0x1   :  { %9 = vsyncpa [#allocation4], 0  ;;  %s151_s12 = smov [#allocation2]  }
   0x2   :  { %s18_s13 = sshll.u32 %s151_s12, 4  ;;  %s19_s13 = int_to_ptr.vmem [resolvable:$true] %s18_s13 }
   0x3   :  { %s115_s14 = scalar_lea.vmem %s19_s13, 128  ;;  %p120_p1 = scmp.lt.s32.totalorder %s19_s13, %s19_s13 }
   0x4   :  { %p116_p0 = scmp.ne.s32.totalorder %s19_s13, %s115_s14  ;;  %p121_p2 = scmp.lt.s32.totalorder %s115_s14, %s115_s14 }
   0x6   :  { %p122_p3 = por %p121_p2, %p120_p1 }
   0x8   :  { %p123_p4 = pnand %p122_p3, %p116_p0 }
   0xa   :  { %126 = shalt.err (!%p123_p4)
}
   0xb   :  { %21 = dma.hbm_to_vmem [thread:$0]  %s186_s1, 128, %s19_s13, [#allocation3]  }
   0xc   :  { %147 = dma.done.wait [#allocation3], 128  }
   0xd   :  { %148 = vsyncadd [#allocation3], 4294967168  ;;  %v27_v0 = vld [vmem:[%s185_s0] sm:$0xff]  ;;  %vm32_vm0 = vcmask 261120   ;;  %vm67_vm2 = vcmask 7168  }
   0xe   :  { %v28_v1 = vld [vmem:[#allocation2] sm:$0xff] }
   0xf   :  { %v29_v2 = vsub.f32 %v27_v0, %v28_v1  ;;  %v49_v16 = vld [vmem:[%s187_s2] sm:$0xff]  ;;  %s152_s2 = smov [#allocation5]  }
  0x10   :  { %v55_v22 = vsub.f32 1.0, %v49_v16  ;;  %s86_s19 = sshll.u32 %s152_s2, 4  ;;  %s87_s19 = int_to_ptr.vmem [resolvable:$true] %s86_s19 }
  0x11   :  { %v30_v3 = vadd.f32 1e-06, %v29_v2  ;;  %s127_s21 = scalar_lea.vmem %s87_s19, 128  ;;  %p132_p6 = scmp.lt.s32.totalorder %s87_s19, %s87_s19 }
  0x12   :  { %p128_p5 = scmp.ne.s32.totalorder %s87_s19, %s127_s21  ;;  %p133_p7 = scmp.lt.s32.totalorder %s127_s21, %s127_s21 }
  0x13   :  { %v31_v4 = vmul.f32 %v30_v3, %v30_v3 }
  0x14   :  { %p134_p8 = por %p133_p7, %p132_p6 }
  0x15   :  { %v33_v5 = vsel %vm32_vm0, %v31_v4, 0.0 }
  0x16   :  { %34 = vadd.xlane.f32.xlu0 %v33_v5  ;;  %p135_p9 = pnand %p134_p8, %p128_p5 }
  0x9f   :  { %v35_v6 = vpop.xlane.xlu0 %34 }
  0xa0   :  { %v95_v7 = vadd.f32 -1.0, %v35_v6 }
  0xa2   :  { %v37_v8 = vmin.f32 %v95_v7, 50.0 }
  0xa4   :  { %v38_v9 = vmul.f32 1.442695, %v37_v8 }
  0xa6   :  { %101 = vpow2.f32 %v38_v9 }
  0xb3   :  { %v102_v10 = vpop.eup %101 }
  0xb4   :  { %v40_v11 = vadd.f32 1.0, %v102_v10  ;;  %v96_v12 = vadd.f32 -0.36787945, %v102_v10  ;;  %v43_v13 = vmul.f32 -0.5, %v102_v10  ;;  %v46_v15 = vand.u32 2147483647, %v102_v10 }
  0xb6   :  { %103 = vlog2.f32 %v40_v11  ;;  %v44_v14 = vadd.f32 1.0, %v43_v13  ;;  %vm47_vm1 = vcmp.lt.f32.partialorder %v46_v15, 0.0004427343 }
  0xb7   :  { %105 = vlog2.f32 %v96_v12 }
  0xb8   :  { %v45_v20 = vmul.f32 %v102_v10, %v44_v14 }
  0xc3   :  { %v104_v17 = vpop.eup %103 }
  0xc4   :  { %v106_v18 = vpop.eup %105  ;;  %v42_v19 = vmul.f32 0.6931472, %v104_v17 }
  0xc5   :  { %v53_v21 = vmul.f32 0.6931472, %v106_v18 }
  0xc6   :  { %v48_v23 = vsel %vm47_vm1, %v45_v20, %v42_v19 }
  0xc7   :  { %v50_v24 = vsub.f32 0.3132617, %v48_v23  ;;  %v54_v25 = vsub.f32 %v53_v21, %v48_v23 }
  0xc9   :  { %v56_v26 = vmul.f32 %v55_v22, %v50_v24  ;;  %v57_v27 = vmul.f32 %v54_v25, %v49_v16 }
  0xcb   :  { %v58_v28 = vadd.f32 %v57_v27, %v56_v26 }
  0xcd   :  { %v59_v29 = vmul.f32 -0.5, %v58_v28 }
  0xcf   :  { %v68_v30 = vsel %vm67_vm2, %v59_v29, 0.0 }
  0xd0   :  { %69 = vadd.xlane.f32.xlu0 %v68_v30 }
 0x159   :  { %v70_v31 = vpop.xlane.xlu0 %69 }
 0x15a   :  { %v71_v32 = vrot.slane %v70_v31, 4 }
 0x15c   :  { %v72_v33 = vadd.f32 %v71_v32, %v70_v31 }
 0x15e   :  { %v73_v34 = vrot.slane %v72_v33, 2 }
 0x160   :  { %v74_v35 = vadd.f32 %v73_v34, %v72_v33 }
 0x162   :  { %v75_v36 = vrot.slane %v74_v35, 1 }
 0x164   :  { %v76_v37 = vadd.f32 %v75_v36, %v74_v35 }
 0x166   :  { %97 = vpush %v76_v37 }
 0x197   :  { %s98_s20 = spop %97 }
 0x198   :  { %v78_v38 = vstv %s98_s20 }
 0x199   :  { %79 = vst [vmem:[#allocation5] sm:$0xff] %v78_v38 }
 0x19a   :  { %138 = shalt.err (!%p135_p9)
}
 0x19b   :  { %89 = dma.vmem_to_hbm [thread:$0]  %s87_s19, 128, %s188_s3, [#allocation4]  }
 0x19c   :  { %149 = dma.done.wait [#allocation4], 128  }
 0x19d   :  { %150 = vsyncadd [#allocation4], 4294967168 }
 0x19e   :  { %93 = vsyncpa [#allocation3], 1 }
 0x19f   :  { %94 = vsyncpa [#allocation4], 1 }

</bundles_post_ra>
